<compile_context>
chip_gen: v6e
topology: v6e:2x2x1
jax: 0.10.0
libtpu: 0.0.40
codegen_flags: <defaults>
</compile_context>

<pallas_src>
import jax
import jax.numpy as jnp
from jax import lax
from jax.experimental import pallas as pl
from jax.experimental.pallas import tpu as pltpu


def _proto_match_kernel(x_ref, pn_ref, pt_ref, recon_ref, idx_ref):
    # x_ref:     (1, C, TS) float32  — one batch element, one spatial tile
    # pn_ref:    (P, C)     float32  — L2-normalized prototype bank (precomputed)
    # pt_ref:    (C, P)     float32  — raw prototype bank, transposed
    # recon_ref: (1, C, TS) float32
    # idx_ref:   (1, 1, TS) int32
    x = x_ref[0]                    # (C, TS)
    pn = pn_ref[...]                # (P, C)
    pt = pt_ref[...]                # (C, P)
    C, TS = x.shape
    P = pn.shape[0]

    eps = jnp.float32(1e-12)        # matches F.normalize eps
    # L2-normalize pixels over channels (sublane reduce over tiny C).
    norm = jnp.maximum(jnp.sqrt(jnp.sum(x * x, axis=0, keepdims=True)), eps)  # (1, TS)
    x_n = x / norm                                                            # (C, TS)

    # Cosine similarities (P, TS): VPU broadcast-MAC over the static channel dim.
    sims = jnp.zeros((P, TS), jnp.float32)
    for c in range(C):              # C is small & static -> unrolled
        sims = sims + pn[:, c:c + 1] * x_n[c:c + 1, :]   # (P,1)*(1,TS) -> (P,TS)

    # First-occurrence argmax over prototypes (sublane axis), like jnp/torch.
    max_val = jnp.max(sims, axis=0, keepdims=True)                    # (1, TS)
    iota_p = lax.broadcasted_iota(jnp.int32, (P, TS), 0)              # (P, TS)
    idx = jnp.min(jnp.where(sims == max_val, iota_p, P),
                  axis=0, keepdims=True)                              # (1, TS) int32
    idx_ref[0] = idx

    # Reconstruction (C, TS): P-way select-accumulate gather of the RAW bank.
    recon = jnp.zeros((C, TS), jnp.float32)
    for p in range(P):              # P is small & static -> unrolled
        mask = (idx == p).astype(jnp.float32)                         # (1, TS)
        recon = recon + pt[:, p:p + 1] * mask                         # (C,1)*(1,TS)
    recon_ref[0] = recon.astype(recon_ref.dtype)


def _pick_spatial_tile(S, max_tile=2048):
    """Largest lane-aligned spatial tile that divides S (bounded for VMEM)."""
    if S <= max_tile:
        return S
    t = (max_tile // 128) * 128
    while t >= 128:
        if S % t == 0:
            return t
        t -= 128
    return S  # fall back: single full-S block


def prototype_matching_forward(x_nchw, prototype_bank):
    """x_nchw: (B, C, H, W) float32; prototype_bank: (P, C) float32."""
    B, C, H, W = x_nchw.shape
    S = H * W
    P = prototype_bank.shape[0]

    # Hoisted, tiny prototype preprocessing (plain JAX, done once per call):
    eps = jnp.float32(1e-12)
    p_norm = jnp.sqrt(jnp.sum(prototype_bank * prototype_bank, axis=1, keepdims=True))
    proto_n = prototype_bank / jnp.maximum(p_norm, eps)   # (P, C) normalized
    proto_t = prototype_bank.T                            # (C, P) raw, transposed (tiny)

    # Free reshape (no transpose): NCHW -> (B, C, S), channels-first for the kernel.
    x_cs = x_nchw.reshape(B, C, S)

    tile_s = _pick_spatial_tile(S)
    n_s = S // tile_s

    # Conservative VMEM budget (blocks are double-buffered); stays below the
    # scoped default on every generation incl. v7x (64 MiB physical).
    pad_c = ((max(C, 1) + 7) // 8) * 8
    blk_bytes = (2 * pad_c + 8) * tile_s * 4              # x + recon + idx blocks
    vmem_limit = int(min(max(8 * 2 * blk_bytes, 4 << 20), 32 << 20))

    recon_cs, idx3 = pl.pallas_call(
        _proto_match_kernel,
        out_shape=(jax.ShapeDtypeStruct((B, C, S), x_nchw.dtype),
                   jax.ShapeDtypeStruct((B, 1, S), jnp.int32)),
        grid_spec=pltpu.PrefetchScalarGridSpec(
            num_scalar_prefetch=0,
            grid=(B, n_s),
            in_specs=[
                pl.BlockSpec((1, C, tile_s), lambda b, st: (b, 0, st)),
                pl.BlockSpec((P, C), lambda b, st: (0, 0)),
                pl.BlockSpec((C, P), lambda b, st: (0, 0)),
            ],
            out_specs=(
                pl.BlockSpec((1, C, tile_s), lambda b, st: (b, 0, st)),
                pl.BlockSpec((1, 1, tile_s), lambda b, st: (b, 0, st)),
            ),
        ),
        compiler_params=pltpu.CompilerParams(
            dimension_semantics=("parallel", "parallel"),
            vmem_limit_bytes=vmem_limit),
    )(x_cs, proto_n, proto_t)

    indices = idx3[:, 0, :]                               # (B, S) int32
    recon_nchw = recon_cs.reshape(B, C, H, W)             # free reshape, no transpose
    return recon_nchw, indices


class PrototypeMatchingModel:
    """JAX mirror of the PyTorch module (deterministic init)."""

    def __init__(self, input_dim, num_prototypes, key):
        self.input_dim = input_dim
        self.num_prototypes = num_prototypes
        # torch.randn(num_prototypes, input_dim) equivalent (synthetic init)
        self.prototype_bank = jax.random.normal(
            key, (num_prototypes, input_dim), jnp.float32)
        self.prototype_usage_counts = None

    def __call__(self, x):
        B, C, H, W = x.shape
        recon, indices = prototype_matching_forward(x, self.prototype_bank)
        if self.prototype_usage_counts is None:
            self.prototype_usage_counts = jnp.zeros(
                (self.num_prototypes, H * W), jnp.int32)
        # scatter_add_(0, indices, ones): counts[indices[b, s], s] += 1 (glue)
        onehot = jax.nn.one_hot(indices, self.num_prototypes, dtype=jnp.int32)
        self.prototype_usage_counts = (
            self.prototype_usage_counts + jnp.transpose(onehot.sum(0), (1, 0)))
        return recon, indices


def _reference_forward(x, bank):
    """Pure-JAX reference matching the PyTorch forward semantics."""
    B, C, H, W = x.shape
    S = H * W
    xf = x.reshape(B, C, S)
    xn = xf / jnp.maximum(jnp.linalg.norm(xf, axis=1, keepdims=True), 1e-12)
    pn = bank / jnp.maximum(jnp.linalg.norm(bank, axis=1, keepdims=True), 1e-12)
    sims = jnp.einsum('bcs,pc->bsp', xn, pn)
    idx = jnp.argmax(sims, axis=2)
    recon = bank[idx]                                                # (B, S, C)
    recon = jnp.transpose(recon.reshape(B, H, W, C), (0, 3, 1, 2))   # NCHW
    return recon, idx


if __name__ == "__main__":
    key = jax.random.PRNGKey(0)
    k_x, k_p = jax.random.split(key)

    B, C, H, W = 2, 4, 16, 16   # input_dim = channels = 4
    P = 8                       # num_prototypes

    x = jax.random.normal(k_x, (B, C, H, W), jnp.float32)
    model = PrototypeMatchingModel(input_dim=C, num_prototypes=P, key=k_p)

    recon, indices = model(x)
    jax.block_until_ready((recon, indices))

    # correctness check against pure-JAX reference
    recon_ref, idx_ref_ = _reference_forward(x, model.prototype_bank)
    assert recon.shape == (B, C, H, W)
    assert indices.shape == (B, H * W)
    # Tie-breaking note: kernel uses first-occurrence argmax (matches jnp.argmax);
    # torch.argmax does not guarantee tie order, so exact ties could diverge benignly.
    assert jnp.array_equal(indices, idx_ref_.astype(indices.dtype))
    assert jnp.allclose(recon, recon_ref, atol=1e-5, rtol=1e-5)
    assert model.prototype_usage_counts.shape == (P, H * W)
    assert int(model.prototype_usage_counts.sum()) == B * H * W

    print("KERNEL_OK")
</pallas_src>

<mosaic_0001>
module attributes {stable_mosaic.version = 11 : i64} {
  func.func @_proto_match_kernel(%arg0: i32, %arg1: i32, %arg2: memref<1x4x256xf32, #tpu.memory_space<vmem>>, %arg3: memref<8x4xf32, #tpu.memory_space<vmem>>, %arg4: memref<4x8xf32, #tpu.memory_space<vmem>>, %arg5: memref<1x4x256xf32, #tpu.memory_space<vmem>>, %arg6: memref<1x1x256xi32, #tpu.memory_space<vmem>>) attributes {dimension_semantics = [#tpu.dimension_semantics<parallel>, #tpu.dimension_semantics<parallel>], iteration_bounds = array<i64: 2, 1>, scalar_prefetch = 0 : i64, scratch_operands = 0 : i64, tpu.core_type = #tpu.core_type<tc>, window_params = [{transform_indices = @transform_0, window_bounds = array<i64: 1, 4, 256>}, {pipeline_mode = #tpu.pipeline_mode<synchronous>, transform_indices = @transform_1, window_bounds = array<i64: 8, 4>}, {pipeline_mode = #tpu.pipeline_mode<synchronous>, transform_indices = @transform_2, window_bounds = array<i64: 4, 8>}, {transform_indices = @transform_3, window_bounds = array<i64: 1, 4, 256>}, {transform_indices = @transform_4, window_bounds = array<i64: 1, 1, 256>}]} {
    %c0 = arith.constant 0 : index
    %c0_0 = arith.constant 0 : index
    %c0_1 = arith.constant 0 : index
    %0 = vector.load %arg2[%c0, %c0_0, %c0_1] : memref<1x4x256xf32, #tpu.memory_space<vmem>>, vector<1x4x256xf32>
    %1 = vector.shape_cast %0 : vector<1x4x256xf32> to vector<4x256xf32>
    %c0_2 = arith.constant 0 : index
    %c0_3 = arith.constant 0 : index
    %2 = vector.load %arg3[%c0_2, %c0_3] : memref<8x4xf32, #tpu.memory_space<vmem>>, vector<8x4xf32>
    %c0_4 = arith.constant 0 : index
    %c0_5 = arith.constant 0 : index
    %3 = vector.load %arg4[%c0_4, %c0_5] : memref<4x8xf32, #tpu.memory_space<vmem>>, vector<4x8xf32>
    %4 = arith.mulf %1, %1 : vector<4x256xf32>
    %cst = arith.constant dense<0.000000e+00> : vector<256xf32>
    %5 = vector.multi_reduction <add>, %4, %cst [0] : vector<4x256xf32> to vector<256xf32>
    %6 = vector.shape_cast %5 : vector<256xf32> to vector<1x256xf32>
    %7 = math.sqrt %6 : vector<1x256xf32>
    %cst_6 = arith.constant 9.99999996E-13 : f32
    %8 = vector.broadcast %cst_6 : f32 to vector<1x256xf32>
    %9 = arith.maximumf %7, %8 : vector<1x256xf32>
    %10 = vector.broadcast %9 : vector<1x256xf32> to vector<4x256xf32>
    %11 = arith.divf %1, %10 : vector<4x256xf32>
    %cst_7 = arith.constant 0.000000e+00 : f32
    %12 = vector.broadcast %cst_7 : f32 to vector<8x256xf32>
    %13 = vector.extract_strided_slice %2 {offsets = [0, 0], sizes = [8, 1], strides = [1, 1]} : vector<8x4xf32> to vector<8x1xf32>
    %14 = vector.extract_strided_slice %11 {offsets = [0, 0], sizes = [1, 256], strides = [1, 1]} : vector<4x256xf32> to vector<1x256xf32>
    %15 = vector.broadcast %13 : vector<8x1xf32> to vector<8x256xf32>
    %16 = vector.broadcast %14 : vector<1x256xf32> to vector<8x256xf32>
    %17 = arith.mulf %15, %16 : vector<8x256xf32>
    %18 = arith.addf %12, %17 : vector<8x256xf32>
    %19 = vector.extract_strided_slice %2 {offsets = [0, 1], sizes = [8, 1], strides = [1, 1]} : vector<8x4xf32> to vector<8x1xf32>
    %20 = vector.extract_strided_slice %11 {offsets = [1, 0], sizes = [1, 256], strides = [1, 1]} : vector<4x256xf32> to vector<1x256xf32>
    %21 = vector.broadcast %19 : vector<8x1xf32> to vector<8x256xf32>
    %22 = vector.broadcast %20 : vector<1x256xf32> to vector<8x256xf32>
    %23 = arith.mulf %21, %22 : vector<8x256xf32>
    %24 = arith.addf %18, %23 : vector<8x256xf32>
    %25 = vector.extract_strided_slice %2 {offsets = [0, 2], sizes = [8, 1], strides = [1, 1]} : vector<8x4xf32> to vector<8x1xf32>
    %26 = vector.extract_strided_slice %11 {offsets = [2, 0], sizes = [1, 256], strides = [1, 1]} : vector<4x256xf32> to vector<1x256xf32>
    %27 = vector.broadcast %25 : vector<8x1xf32> to vector<8x256xf32>
    %28 = vector.broadcast %26 : vector<1x256xf32> to vector<8x256xf32>
    %29 = arith.mulf %27, %28 : vector<8x256xf32>
    %30 = arith.addf %24, %29 : vector<8x256xf32>
    %31 = vector.extract_strided_slice %2 {offsets = [0, 3], sizes = [8, 1], strides = [1, 1]} : vector<8x4xf32> to vector<8x1xf32>
    %32 = vector.extract_strided_slice %11 {offsets = [3, 0], sizes = [1, 256], strides = [1, 1]} : vector<4x256xf32> to vector<1x256xf32>
    %33 = vector.broadcast %31 : vector<8x1xf32> to vector<8x256xf32>
    %34 = vector.broadcast %32 : vector<1x256xf32> to vector<8x256xf32>
    %35 = arith.mulf %33, %34 : vector<8x256xf32>
    %36 = arith.addf %30, %35 : vector<8x256xf32>
    %cst_8 = arith.constant dense<0xFF800000> : vector<256xf32>
    %37 = vector.multi_reduction <maximumf>, %36, %cst_8 [0] : vector<8x256xf32> to vector<256xf32>
    %38 = vector.shape_cast %37 : vector<256xf32> to vector<1x256xf32>
    %39 = tpu.iota {dimensions = array<i32: 0>} : vector<8x256xi32>
    %40 = vector.broadcast %38 : vector<1x256xf32> to vector<8x256xf32>
    %41 = arith.cmpf oeq, %36, %40 : vector<8x256xf32>
    %c8_i32 = arith.constant 8 : i32
    %42 = vector.broadcast %c8_i32 : i32 to vector<8x256xi32>
    %43 = arith.select %41, %39, %42 : vector<8x256xi1>, vector<8x256xi32>
    %cst_9 = arith.constant dense<2147483647> : vector<256xi32>
    %44 = vector.multi_reduction <minsi>, %43, %cst_9 [0] : vector<8x256xi32> to vector<256xi32>
    %45 = vector.shape_cast %44 : vector<256xi32> to vector<1x256xi32>
    %c0_10 = arith.constant 0 : index
    %c0_11 = arith.constant 0 : index
    %c0_12 = arith.constant 0 : index
    %46 = vector.load %arg6[%c0_10, %c0_11, %c0_12] : memref<1x1x256xi32, #tpu.memory_space<vmem>>, vector<1x1x256xi32>
    %47 = vector.shape_cast %46 : vector<1x1x256xi32> to vector<1x256xi32>
    %48 = vector.shape_cast %45 : vector<1x256xi32> to vector<1x1x256xi32>
    tpu.vector_store %arg6[%c0_10, %c0_11, %c0_12], %48 {strides = array<i32>} : memref<1x1x256xi32, #tpu.memory_space<vmem>>, vector<1x1x256xi32>,
    %cst_13 = arith.constant 0.000000e+00 : f32
    %49 = vector.broadcast %cst_13 : f32 to vector<4x256xf32>
    %c0_i32 = arith.constant 0 : i32
    %50 = vector.broadcast %c0_i32 : i32 to vector<1x256xi32>
    %51 = arith.cmpi eq, %45, %50 : vector<1x256xi32>
    %52 = arith.extui %51 : vector<1x256xi1> to vector<1x256xi32>
    %53 = arith.sitofp %52 : vector<1x256xi32> to vector<1x256xf32>
    %54 = vector.extract_strided_slice %3 {offsets = [0, 0], sizes = [4, 1], strides = [1, 1]} : vector<4x8xf32> to vector<4x1xf32>
    %55 = vector.broadcast %54 : vector<4x1xf32> to vector<4x256xf32>
    %56 = vector.broadcast %53 : vector<1x256xf32> to vector<4x256xf32>
    %57 = arith.mulf %55, %56 : vector<4x256xf32>
    %58 = arith.addf %49, %57 : vector<4x256xf32>
    %c1_i32 = arith.constant 1 : i32
    %59 = vector.broadcast %c1_i32 : i32 to vector<1x256xi32>
    %60 = arith.cmpi eq, %45, %59 : vector<1x256xi32>
    %61 = arith.extui %60 : vector<1x256xi1> to vector<1x256xi32>
    %62 = arith.sitofp %61 : vector<1x256xi32> to vector<1x256xf32>
    %63 = vector.extract_strided_slice %3 {offsets = [0, 1], sizes = [4, 1], strides = [1, 1]} : vector<4x8xf32> to vector<4x1xf32>
    %64 = vector.broadcast %63 : vector<4x1xf32> to vector<4x256xf32>
    %65 = vector.broadcast %62 : vector<1x256xf32> to vector<4x256xf32>
    %66 = arith.mulf %64, %65 : vector<4x256xf32>
    %67 = arith.addf %58, %66 : vector<4x256xf32>
    %c2_i32 = arith.constant 2 : i32
    %68 = vector.broadcast %c2_i32 : i32 to vector<1x256xi32>
    %69 = arith.cmpi eq, %45, %68 : vector<1x256xi32>
    %70 = arith.extui %69 : vector<1x256xi1> to vector<1x256xi32>
    %71 = arith.sitofp %70 : vector<1x256xi32> to vector<1x256xf32>
    %72 = vector.extract_strided_slice %3 {offsets = [0, 2], sizes = [4, 1], strides = [1, 1]} : vector<4x8xf32> to vector<4x1xf32>
    %73 = vector.broadcast %72 : vector<4x1xf32> to vector<4x256xf32>
    %74 = vector.broadcast %71 : vector<1x256xf32> to vector<4x256xf32>
    %75 = arith.mulf %73, %74 : vector<4x256xf32>
    %76 = arith.addf %67, %75 : vector<4x256xf32>
    %c3_i32 = arith.constant 3 : i32
    %77 = vector.broadcast %c3_i32 : i32 to vector<1x256xi32>
    %78 = arith.cmpi eq, %45, %77 : vector<1x256xi32>
    %79 = arith.extui %78 : vector<1x256xi1> to vector<1x256xi32>
    %80 = arith.sitofp %79 : vector<1x256xi32> to vector<1x256xf32>
    %81 = vector.extract_strided_slice %3 {offsets = [0, 3], sizes = [4, 1], strides = [1, 1]} : vector<4x8xf32> to vector<4x1xf32>
    %82 = vector.broadcast %81 : vector<4x1xf32> to vector<4x256xf32>
    %83 = vector.broadcast %80 : vector<1x256xf32> to vector<4x256xf32>
    %84 = arith.mulf %82, %83 : vector<4x256xf32>
    %85 = arith.addf %76, %84 : vector<4x256xf32>
    %c4_i32 = arith.constant 4 : i32
    %86 = vector.broadcast %c4_i32 : i32 to vector<1x256xi32>
    %87 = arith.cmpi eq, %45, %86 : vector<1x256xi32>
    %88 = arith.extui %87 : vector<1x256xi1> to vector<1x256xi32>
    %89 = arith.sitofp %88 : vector<1x256xi32> to vector<1x256xf32>
    %90 = vector.extract_strided_slice %3 {offsets = [0, 4], sizes = [4, 1], strides = [1, 1]} : vector<4x8xf32> to vector<4x1xf32>
    %91 = vector.broadcast %90 : vector<4x1xf32> to vector<4x256xf32>
    %92 = vector.broadcast %89 : vector<1x256xf32> to vector<4x256xf32>
    %93 = arith.mulf %91, %92 : vector<4x256xf32>
    %94 = arith.addf %85, %93 : vector<4x256xf32>
    %c5_i32 = arith.constant 5 : i32
    %95 = vector.broadcast %c5_i32 : i32 to vector<1x256xi32>
    %96 = arith.cmpi eq, %45, %95 : vector<1x256xi32>
    %97 = arith.extui %96 : vector<1x256xi1> to vector<1x256xi32>
    %98 = arith.sitofp %97 : vector<1x256xi32> to vector<1x256xf32>
    %99 = vector.extract_strided_slice %3 {offsets = [0, 5], sizes = [4, 1], strides = [1, 1]} : vector<4x8xf32> to vector<4x1xf32>
    %100 = vector.broadcast %99 : vector<4x1xf32> to vector<4x256xf32>
    %101 = vector.broadcast %98 : vector<1x256xf32> to vector<4x256xf32>
    %102 = arith.mulf %100, %101 : vector<4x256xf32>
    %103 = arith.addf %94, %102 : vector<4x256xf32>
    %c6_i32 = arith.constant 6 : i32
    %104 = vector.broadcast %c6_i32 : i32 to vector<1x256xi32>
    %105 = arith.cmpi eq, %45, %104 : vector<1x256xi32>
    %106 = arith.extui %105 : vector<1x256xi1> to vector<1x256xi32>
    %107 = arith.sitofp %106 : vector<1x256xi32> to vector<1x256xf32>
    %108 = vector.extract_strided_slice %3 {offsets = [0, 6], sizes = [4, 1], strides = [1, 1]} : vector<4x8xf32> to vector<4x1xf32>
    %109 = vector.broadcast %108 : vector<4x1xf32> to vector<4x256xf32>
    %110 = vector.broadcast %107 : vector<1x256xf32> to vector<4x256xf32>
    %111 = arith.mulf %109, %110 : vector<4x256xf32>
    %112 = arith.addf %103, %111 : vector<4x256xf32>
    %c7_i32 = arith.constant 7 : i32
    %113 = vector.broadcast %c7_i32 : i32 to vector<1x256xi32>
    %114 = arith.cmpi eq, %45, %113 : vector<1x256xi32>
    %115 = arith.extui %114 : vector<1x256xi1> to vector<1x256xi32>
    %116 = arith.sitofp %115 : vector<1x256xi32> to vector<1x256xf32>
    %117 = vector.extract_strided_slice %3 {offsets = [0, 7], sizes = [4, 1], strides = [1, 1]} : vector<4x8xf32> to vector<4x1xf32>
    %118 = vector.broadcast %117 : vector<4x1xf32> to vector<4x256xf32>
    %119 = vector.broadcast %116 : vector<1x256xf32> to vector<4x256xf32>
    %120 = arith.mulf %118, %119 : vector<4x256xf32>
    %121 = arith.addf %112, %120 : vector<4x256xf32>
    %c0_14 = arith.constant 0 : index
    %c0_15 = arith.constant 0 : index
    %c0_16 = arith.constant 0 : index
    %122 = vector.load %arg5[%c0_14, %c0_15, %c0_16] : memref<1x4x256xf32, #tpu.memory_space<vmem>>, vector<1x4x256xf32>
    %123 = vector.shape_cast %122 : vector<1x4x256xf32> to vector<4x256xf32>
    %124 = vector.shape_cast %121 : vector<4x256xf32> to vector<1x4x256xf32>
    tpu.vector_store %arg5[%c0_14, %c0_15, %c0_16], %124 {strides = array<i32>} : memref<1x4x256xf32, #tpu.memory_space<vmem>>, vector<1x4x256xf32>,
    return
  }
  func.func @transform_0(%arg0: i32, %arg1: i32) -> (i32, i32, i32) {
    %c0_i32 = arith.constant 0 : i32
    %c0_i32_0 = arith.constant 0 : i32
    return %arg0, %c0_i32, %arg1 : i32, i32, i32
  }
  func.func @transform_1(%arg0: i32, %arg1: i32) -> (i32, i32) {
    %c0_i32 = arith.constant 0 : i32
    %c0_i32_0 = arith.constant 0 : i32
    %c0_i32_1 = arith.constant 0 : i32
    return %c0_i32, %c0_i32_0 : i32, i32
  }
  func.func @transform_2(%arg0: i32, %arg1: i32) -> (i32, i32) {
    %c0_i32 = arith.constant 0 : i32
    %c0_i32_0 = arith.constant 0 : i32
    %c0_i32_1 = arith.constant 0 : i32
    return %c0_i32, %c0_i32_0 : i32, i32
  }
  func.func @transform_3(%arg0: i32, %arg1: i32) -> (i32, i32, i32) {
    %c0_i32 = arith.constant 0 : i32
    %c0_i32_0 = arith.constant 0 : i32
    return %arg0, %c0_i32, %arg1 : i32, i32, i32
  }
  func.func @transform_4(%arg0: i32, %arg1: i32) -> (i32, i32, i32) {
    %c0_i32 = arith.constant 0 : i32
    %c0_i32_0 = arith.constant 0 : i32
    return %arg0, %c0_i32, %arg1 : i32, i32, i32
  }
}

</mosaic_0001>

<bundles_post_ra>
// kernel: tpu_custom_call.1
= control target key start
LH: loop header
LB: loop body
LE: loop exit
PB: predicated region body
PF: predicated region fallthrough
CT: control target
= control target key end

     0   :  { %10 = vsyncpa [#allocation3], 0  ;;  %s1266_s0 = inlined_call_operand.hbm [shape: f32[2,4,256], index: 0, kind: input, shape index: {}]   ;;  %s1267_s1 = inlined_call_operand.vmem [shape: f32[8,4], index: 1, kind: input, shape index: {}]   ;;  %s1268_s2 = inlined_call_operand.vmem [shape: f32[4,8], index: 2, kind: input, shape index: {}]   ;;  %s1269_s3 = inlined_call_operand.hbm [shape: f32[2,4,256], index: 3, kind: output, shape index: {0}]   ;;  %s1270_s4 = inlined_call_operand.hbm [shape: s32[2,1,256], index: 4, kind: output, shape index: {1}]  }
   0x1   :  { %12 = vsyncpa [#allocation3 + $0x1], 0 }
   0x2   :  { %13 = vsyncpa [#allocation4], 0 }
   0x3   :  { %15 = vsyncpa [#allocation4 + $0x1], 0 }
   0x4   :  { %16 = vsyncpa [#allocation7], 0 }
   0x5   :  { %18 = vsyncpa [#allocation7 + $0x1], 0  ;;  %s1040_s15 = smov 0   ;;  %s1042_s16 = smov 0  }
   0x6   :  { %s1044_s17 = smov 0   ;;  %s1046_s18 = smov 0  }
   0x7   :  { %s1048_s19 = smov 0   ;;  %s1050_s20 = smov 0  }
   0x8 LB: > { %s729_s21 = sadd.s32 4294967295, %s1000_s20   ;;  %s730_s22 = sadd.s32 4294967294, %s1000_s20   ;;  %s1000_s20 = sphi %s1050_s20, %s24_s20   ;;  %s996_s19 = sphi %s1048_s19, %s1282_s19   ;;  %s992_s18 = sphi %s1046_s18, %s1281_s18   ;;  %s988_s17 = sphi %s1044_s17, %s1280_s17   ;;  %s984_s16 = sphi %s1042_s16, %s1279_s16   ;;  %s980_s15 = sphi %s1040_s15, %s1278_s15  }
   0x9   : > { %s36_s23 = sadd.s32 1, %s996_s19  ;;  %s45_s24 = sadd.s32 1, %s988_s17 }
   0xa   : > { %p38_p0 = scmp.ge.s32.totalorder %s36_s23, 2  ;;  %p52_p1 = scmp.ne.s32.totalorder %s988_s17, %s984_s16 }
   0xb   : > { %p53_p2 = scmp.eq.s32.totalorder %s1000_s20, 0  ;;  %p58_p3 = scmp.ne.s32.totalorder %s984_s16, %s980_s15 }
   0xc   : > { %s1284_s23 = smov (%p38_p0, %s36_s23), 0  ;;  %p59_p5 = scmp.eq.s32.totalorder %s729_s21, 0 }
   0xd   : > { %p1081_p4 = por %p53_p2, %p52_p1  ;;  %s40_s26 = ssub.s32 %s996_s19, %s1284_s23 }
   0xe   : > { %p126_p6 = scmp.eq.s32.totalorder %s729_s21, 1  ;;  %p43_p7 = scmp.eq.s32.totalorder %s40_s26, 0 }
   0xf   : > { %p1087_p8 = por %p59_p5, %p58_p3  ;;  %p132_p10 = scmp.eq.s32.totalorder %s730_s22, 1 }
  0x10   : > { %p1091_p9 = por %p126_p6, %p52_p1  ;;  %p784_p13 = scmp.lt.s32.totalorder %s1000_s20, 2 }
  0x11   : > { %s1096_s29 = scalar_select %p43_p7, %s988_s17, %s45_s24  }
  0x12   : > { %p1098_p11 = por %p132_p10, %p58_p3  ;;  %s186_s5 = sand.u32 1, %s988_s17  }
  0x13   : > { %s733_s6 = sshll.u32 %s186_s5, 3  ;;  %s764_s7 = sshll.u32 %s996_s19, 7 }
  0x14   : > { %s1274_s30 = scalar_select %p1098_p11, 1, 0 }
  0x15   : > { %s198_s10 = scalar_lea.hbm %s1266_s0, %s764_s7  ;;  %s190_s11 = scalar_lea.vmem [#allocation2], %s733_s6 }
  0x16   : > { %s200_s12 = sshll.u32 %s190_s11, 4  ;;  %p1111_p0 = pnand %p784_p13, %p1081_p4  ;;  %s201_s12 = int_to_ptr.vmem [resolvable:$true] %s200_s12 }
  0x17   : > { %p736_p1 = scmp.ge.s32.totalorder %s1000_s20, 1  ;;  %p205_p2 = scmp.lt.s32.totalorder %s1000_s20, 3 }
  0x18   : > { %s187_s14 = scalar_lea.sflag [#allocation3], %s186_s5  ;;  %p864_p3 = pneg %p1111_p0 }
  0x19   : > { %s875_s21 = scalar_lea.vmem %s201_s12, 128  ;;  %s1002_s22 = smov [#allocation2]  }
  0x1a   : > { %p876_p5 = scmp.ne.s32.totalorder %s201_s12, %s875_s21  ;;  %s880_s24 = sshll.u32 %s1002_s22, 4  ;;  %s881_s24 = int_to_ptr.vmem [resolvable:$false] %s880_s24 }
  0x1b   : > { %s882_s26 = scalar_lea.vmem %s881_s24, 256  ;;  %p883_p10 = scmp.lt.s32.totalorder %s201_s12, %s881_s24 }
  0x1c   : > { %p878_p6 = pnand %p876_p5, %p864_p3  ;;  %p884_p12 = scmp.lt.s32.totalorder %s882_s26, %s875_s21 }
  0x1e   : > { %p879_p7 = pneg %p878_p6  ;;  %p885_p4 = por %p884_p12, %p883_p10 }
  0x20   : > { %p886_p13 = pnand %p885_p4, %p879_p7 }
  0x22   : > { %889 = shalt.err (!%p886_p13)
}
  0x23   : > { %776 = dma.hbm_to_vmem [thread:$0]  (!%p1111_p0), %s198_s10, 128, %s201_s12, %s187_s14  }
  0x24   : > { %p206_p11 = pnand %p736_p1, %p205_p2 }
  0x25   : > { %s1126_s25 = sand.u32 (!%p206_p11), 1, %s984_s16  }
  0x26   : > { %209 = sbr.rel (%p206_p11) target bundleno = 262 (0x106), region = 32  ;;  %s737_s5 = sshll.u32 (!%p206_p11), %s1126_s25, 3 }
  0x27   : > { %s212_s6 = scalar_lea.sflag (!%p206_p11), [#allocation3], %s1126_s25  ;;  %s1132_s7 = scalar_lea.vmem (!%p206_p11), [#allocation2], %s737_s5 }
  0x2b   : > { %967 = dma.done.wait (%p1087_p8), %s212_s6, 128  }
  0x2c   : > { %969 = vsyncadd (%p1087_p8), %s212_s6, 4294967168  ;;  %v1003_v0 = vmov 0   ;;  %v1004_v1 = vmov 2   ;;  %v249_v2 = vld [vmem:[%s1267_s1] sm:$0xff]  ;;  %v1005_v3 = vmov 1   ;;  %v1006_v4 = vmov 3  }
  0x2d   : > { %844 = vset.pattern.permute.xlu0 %v1003_v0  ;;  %846 = vset.pattern.permute.xlu1 %v1004_v1  ;;  %v250_v5 = vld [vmem:[%s1268_s2] sm:$0xf]  ;;  %v1007_v6 = vmov 6   ;;  %v1008_v7 = vmov 4   ;;  %v1009_v8 = vmov 7   ;;  %v1010_v9 = vmov 5  }
  0x2e   : > { %294 = vperm.xlu0 %844, %v249_v2   ;;  %347 = vperm.xlu1 %846, %v249_v2   ;;  %v248_v10 = vld [vmem:[%s1132_s7] sm:$0xff]  ;;  %vm255_vm0 = vcmask 1043456   ;;  %v298_v40 = vlaneseq  ;;  %s739_s27 = sshll.u32 %s1126_s25, 1  ;;  %s766_s12 = sshll.u32 %s992_s18, 5 }
  0x2f   : > { %v251_v11 = vmul.f32 %v248_v10, %v248_v10  ;;  %s244_s13 = scalar_lea.vmem [#allocation6], %s739_s27  ;;  %s1191_s24 = scalar_lea.hbm %s1270_s4, %s766_s12 }
  0x30   : > { %v1146_v41 = vshrl.u32 %v298_v40, 7  ;;  %s610_s14 = sshll.u32 %s244_s13, 4  ;;  %s765_s26 = sshll.u32 %s992_s18, 7  ;;  %s1193_s14 = int_to_ptr.vmem [resolvable:$true] %s610_s14 }
  0x31   : > { %v253_v12 = vcombine.high %v251_v11, %v251_v11  ;;  %v256_v13 = vsel %vm255_vm0, %v251_v11, 0.0  ;;  %s1198_s6 = scalar_lea.vmem [#allocation5], %s737_s5  ;;  %s578_s8 = scalar_lea.sflag [#allocation7], %s1126_s25 }
  0x32   : > { %845 = vset.pattern.permute.xlu0 %v1005_v3  ;;  %847 = vset.pattern.permute.xlu1 %v1006_v4  ;;  %v257_v15 = vrot.slane %v256_v13, 4  ;;  %v300_v43 = vsub.s32 0, %v1146_v41  ;;  %v304_v44 = vsub.s32 4, %v1146_v41  ;;  %v326_v46 = vsub.s32 1, %v1146_v41  ;;  %s594_s7 = sshll.u32 %s1198_s6, 4  ;;  %s890_s9 = scalar_lea.vmem %s1193_s14, 32  ;;  %s595_s7 = int_to_ptr.vmem [resolvable:$true] %s594_s7 }
  0x33   : > { %321 = vperm.xlu0 %845, %v249_v2   ;;  %373 = vperm.xlu1 %847, %v249_v2   ;;  %v263_v14 = vsel %vm255_vm0, %v253_v12, 0.0  ;;  %v330_v47 = vsub.s32 5, %v1146_v41  ;;  %v352_v48 = vsub.s32 2, %v1146_v41  ;;  %v356_v49 = vsub.s32 6, %v1146_v41  ;;  %p891_p8 = scmp.ne.s32.totalorder %s1193_s14, %s890_s9  ;;  %s1013_s10 = smov [#allocation6]  }
  0x34   : > { %v264_v16 = vrot.slane %v263_v14, 4  ;;  %v258_v17 = vadd.f32 %v257_v15, %v256_v13  ;;  %v378_v50 = vsub.s32 3, %v1146_v41  ;;  %v382_v51 = vsub.s32 7, %v1146_v41  ;;  %s894_s11 = sshll.u32 %s1013_s10, 4  ;;  %s895_s11 = int_to_ptr.vmem [resolvable:$false] %s894_s11 }
  0x35   : > { %p892_p11 = pnand %p891_p8, %p1091_p9  ;;  %s896_s27 = scalar_lea.vmem %s895_s11, 64 }
  0x36   : > { %v265_v18 = vadd.f32 %v264_v16, %v263_v14  ;;  %v259_v19 = vrot.slane %v258_v17, 2  ;;  %p897_p0 = scmp.lt.s32.totalorder %s1193_s14, %s895_s11  ;;  %p898_p1 = scmp.lt.s32.totalorder %s896_s27, %s890_s9 }
  0x37   : > { %476 = vperm.xlu0 %845, %v250_v5   ;;  %848 = vset.pattern.permute.xlu1 %v1003_v0  ;;  %p893_p12 = pneg %p892_p11 }
  0x38   : > { %462 = vperm.xlu1 %848, %v250_v5   ;;  %v266_v20 = vrot.slane %v265_v18, 2  ;;  %v260_v21 = vadd.f32 %v259_v19, %v258_v17  ;;  %p899_p2 = por %p898_p1, %p897_p0 }
  0x3a   : > { %v267_v22 = vadd.f32 %v266_v20, %v265_v18  ;;  %v261_v23 = vrot.slane %v260_v21, 1  ;;  %p900_p3 = pnand %p899_p2, %p893_p12 }
  0x3b   : > { %850 = vset.pattern.permute.xlu0 %v1006_v4 }
  0x3c   : > { %849 = vset.pattern.permute.xlu1 %v1004_v1  ;;  %504 = vperm.xlu0 %850, %v250_v5   ;;  %v268_v24 = vrot.slane %v267_v22, 1  ;;  %v262_v25 = vadd.f32 %v261_v23, %v260_v21 }
  0x3d   : > { %490 = vperm.xlu1 %849, %v250_v5  }
  0x3e   : > { %v269_v26 = vadd.f32 %v268_v24, %v267_v22  ;;  %856 = vrsqrt.f32 %v262_v25  ;;  %vm272_vm1 = vcmp.eq.f32.partialorder %v262_v25, inf  ;;  %v275_v31 = vand.u32 2147483648, %v262_v25 }
  0x3f   : > { %vm274_vm3 = vcmp.eq.f32.partialorder %v262_v25, 0.0 }
  0x40   : > { %853 = vset.pattern.permute.xlu0 %v1007_v6  ;;  %858 = vrsqrt.f32 %v269_v26  ;;  %vm279_vm2 = vcmp.eq.f32.partialorder %v269_v26, inf  ;;  %v282_v32 = vand.u32 2147483648, %v269_v26  ;;  %vm281_vm4 = vcmp.eq.f32.partialorder %v269_v26, 0.0 }
  0x41   : > { %851 = vset.pattern.permute.xlu1 %v1008_v7  ;;  %546 = vperm.xlu0 %853, %v250_v5  }
  0x42   : > { %518 = vperm.xlu1 %851, %v250_v5  }
  0x45   : > { %855 = vset.pattern.permute.xlu0 %v1009_v8 }
  0x46   : > { %852 = vset.pattern.permute.xlu1 %v1010_v9 }
  0x47   : > { %532 = vperm.xlu1 %852, %v250_v5  }
  0x4b   : > { %854 = vset.pattern.permute.xlu1 %v1009_v8  ;;  %v857_v27 = vpop.eup %856 }
  0x4c   : > { %560 = vperm.xlu1 %854, %v250_v5   ;;  %v271_v29 = vmul.f32 %v857_v27, %v262_v25 }
  0x4d   : > { %v859_v28 = vpop.eup %858 }
  0x4e   : > { %v278_v30 = vmul.f32 %v859_v28, %v269_v26  ;;  %v273_v33 = vsel %vm272_vm1, %v262_v25, %v271_v29 }
  0x4f   : > { %v276_v35 = vsel %vm274_vm3, %v275_v31, %v273_v33 }
  0x50   : > { %v280_v34 = vsel %vm279_vm2, %v269_v26, %v278_v30  ;;  %v284_v37 = vmax.f32 %v276_v35, 1e-12 }
  0x51   : > { %v283_v36 = vsel %vm281_vm4, %v282_v32, %v280_v34 }
  0x52   : > { %v285_v38 = vmax.f32 %v283_v36, 1e-12 }
  0x54   : > { %v288_v39 = vcombine.low %v284_v37, %v285_v38 }
  0x56   : > { %860 = vrcp.f32 %v288_v39 }
  0x63   : > { %v861_v42 = vpop.eup %860 }
  0x64   : > { %v291_v45 = vmul.f32 %v861_v42, %v248_v10 }
  0x66   : > { %v301_v52 = vrot.slane %v291_v45, %v300_v43  ;;  %v305_v53 = vrot.slane %v291_v45, %v304_v44  ;;  %v327_v54 = vrot.slane %v291_v45, %v326_v46  ;;  %v331_v55 = vrot.slane %v291_v45, %v330_v47 }
  0x67   : > { %v353_v56 = vrot.slane %v291_v45, %v352_v48  ;;  %v357_v57 = vrot.slane %v291_v45, %v356_v49  ;;  %v379_v60 = vrot.slane %v291_v45, %v378_v50  ;;  %v383_v61 = vrot.slane %v291_v45, %v382_v51 }
  0x68   : > { %v311_v62 = vrot.slane %v301_v52, %v300_v43  ;;  %v315_v63 = vrot.slane %v305_v53, %v300_v43  ;;  %v337_v0 = vrot.slane %v327_v54, %v326_v46  ;;  %v341_v1 = vrot.slane %v331_v55, %v326_v46 }
  0x69   : > { %v363_v2 = vrot.slane %v353_v56, %v352_v48  ;;  %v367_v3 = vrot.slane %v357_v57, %v352_v48  ;;  %v389_v4 = vrot.slane %v379_v60, %v378_v50  ;;  %v393_v5 = vrot.slane %v383_v61, %v378_v50 }
  0x6a   : > { %v1011_v52 = vmov 1966171168   ;;  %v1012_v55 = vmov 0.0  }
  0x6b   : > { %v436_v53 = vunpack.c.l.s4 %v1011_v52 }
  0xa9   : > { %v295_v58 = vpop.permute.xlu0 %294  ;;  %v348_v59 = vpop.permute.xlu1 %347 }
  0xaa   : > { %v316_v8 = vmul.f32 %v311_v62, %v295_v58  ;;  %v317_v9 = vmul.f32 %v315_v63, %v295_v58  ;;  %v368_v12 = vmul.f32 %v363_v2, %v348_v59  ;;  %v369_v13 = vmul.f32 %v367_v3, %v348_v59 }
  0xae   : > { %v322_v6 = vpop.permute.xlu0 %321  ;;  %v374_v7 = vpop.permute.xlu1 %373 }
  0xaf   : > { %v342_v10 = vmul.f32 %v337_v0, %v322_v6  ;;  %v343_v11 = vmul.f32 %v341_v1, %v322_v6  ;;  %v394_v16 = vmul.f32 %v389_v4, %v374_v7  ;;  %v395_v17 = vmul.f32 %v393_v5, %v374_v7 }
  0xb0   : > { %v437_v5 = vunpack.c.0.s8 %v436_v53 }
  0xb1   : > { %v344_v14 = vadd.f32 %v342_v10, %v316_v8  ;;  %v345_v15 = vadd.f32 %v343_v11, %v317_v9 }
  0xb2   : > { %v477_v54 = vpop.permute.xlu0 %476 }
  0xb3   : > { %v370_v18 = vadd.f32 %v368_v12, %v344_v14  ;;  %v371_v19 = vadd.f32 %v369_v13, %v345_v15  ;;  %v463_v42 = vpop.permute.xlu1 %462 }
  0xb5   : > { %v396_v20 = vadd.f32 %v394_v16, %v370_v18  ;;  %v397_v21 = vadd.f32 %v395_v17, %v371_v19  ;;  %v440_v16 = vsub.s32 %v437_v5, %v1146_v41 }
  0xb7   : > { %v398_v22 = vrot.slane %v396_v20, 4  ;;  %v404_v23 = vrot.slane %v397_v21, 4  ;;  %v505_v10 = vpop.permute.xlu0 %504 }
  0xb8   : > { %v491_v49 = vpop.permute.xlu1 %490 }
  0xb9   : > { %v399_v24 = vmax.f32 %v396_v20, %v398_v22  ;;  %v405_v25 = vmax.f32 %v397_v21, %v404_v23 }
  0xbb   : > { %v400_v26 = vrot.slane %v399_v24, 2  ;;  %v406_v27 = vrot.slane %v405_v25, 2 }
  0xbd   : > { %v401_v28 = vmax.f32 %v399_v24, %v400_v26  ;;  %v407_v29 = vmax.f32 %v405_v25, %v406_v27  ;;  %v519_v0 = vpop.permute.xlu1 %518 }
  0xbf   : > { %v402_v30 = vrot.slane %v401_v28, 1  ;;  %v408_v31 = vrot.slane %v407_v29, 1 }
  0xc1   : > { %v403_v32 = vmax.f32 %v401_v28, %v402_v30  ;;  %v409_v33 = vmax.f32 %v407_v29, %v408_v31 }
  0xc2   : > { %v533_v13 = vpop.permute.xlu1 %532 }
  0xc3   : > { %vm412_vm5 = vcmp.eq.f32.partialorder %v396_v20, %v403_v32  ;;  %vm413_vm6 = vcmp.eq.f32.partialorder %v397_v21, %v409_v33 }
  0xc4   : > { %v414_v34 = vsel %vm412_vm5, %v1146_v41, 8  ;;  %v415_v35 = vsel %vm413_vm6, %v1146_v41, 8  ;;  %v547_v41 = vpop.permute.xlu0 %546 }
  0xc5   : > { %v416_v36 = vrot.slane %v414_v34, 4  ;;  %v425_v37 = vrot.slane %v415_v35, 4 }
  0xc7   : > { %vm417_vm7 = vcmp.lt.s32.totalorder %v414_v34, %v416_v36  ;;  %vm426_vm8 = vcmp.lt.s32.totalorder %v415_v35, %v425_v37  ;;  %v561_v32 = vpop.permute.xlu1 %560 }
  0xc8   : > { %v418_v38 = vsel %vm417_vm7, %v414_v34, %v416_v36  ;;  %v427_v39 = vsel %vm426_vm8, %v415_v35, %v425_v37 }
  0xc9   : > { %v419_v43 = vrot.slane %v418_v38, 2  ;;  %v428_v44 = vrot.slane %v427_v39, 2 }
  0xcb   : > { %vm420_vm9 = vcmp.lt.s32.totalorder %v418_v38, %v419_v43  ;;  %vm429_vm10 = vcmp.lt.s32.totalorder %v427_v39, %v428_v44 }
  0xcc   : > { %v421_v45 = vsel %vm420_vm9, %v418_v38, %v419_v43  ;;  %v430_v46 = vsel %vm429_vm10, %v427_v39, %v428_v44 }
  0xcd   : > { %v422_v47 = vrot.slane %v421_v45, 1  ;;  %v431_v48 = vrot.slane %v430_v46, 1 }
  0xcf   : > { %vm423_vm11 = vcmp.lt.s32.totalorder %v421_v45, %v422_v47  ;;  %vm432_vm12 = vcmp.lt.s32.totalorder %v430_v46, %v431_v48 }
  0xd0   : > { %v1158_v50 = vsel %vm423_vm11, %v421_v45, %v422_v47  ;;  %v1160_v51 = vsel %vm432_vm12, %v430_v46, %v431_v48 }
  0xd1   : > { %vm469_vm13 = vcmp.eq.s32.totalorder %v1158_v50, 1  ;;  %vm470_vm14 = vcmp.eq.s32.totalorder %v1160_v51, 1  ;;  %vm454_vm15 = vcmp.eq.s32.totalorder %v1158_v50, 0  ;;  %vm455_vm0 = vcmp.eq.s32.totalorder %v1160_v51, 0 }
  0xd2   : > { %v742_v56 = vsel %vm469_vm13, 1.0, %v1012_v55  ;;  %v743_v57 = vsel %vm470_vm14, 1.0, %v1012_v55  ;;  %v740_v58 = vsel %vm454_vm15, 1.0, %v1012_v55  ;;  %v741_v59 = vsel %vm455_vm0, 1.0, %v1012_v55 }
  0xd3   : > { %v479_v60 = vmul.f32 %v742_v56, %v477_v54  ;;  %v480_v61 = vmul.f32 %v743_v57, %v477_v54  ;;  %v465_v62 = vmul.f32 %v740_v58, %v463_v42  ;;  %v466_v63 = vmul.f32 %v741_v59, %v463_v42 }
  0xd4   : > { %vm483_vm1 = vcmp.eq.s32.totalorder %v1158_v50, 2  ;;  %vm484_vm2 = vcmp.eq.s32.totalorder %v1160_v51, 2  ;;  %vm511_vm3 = vcmp.eq.s32.totalorder %v1158_v50, 4  ;;  %vm512_vm4 = vcmp.eq.s32.totalorder %v1160_v51, 4 }
  0xd5   : > { %v481_v1 = vadd.f32 %v479_v60, %v465_v62  ;;  %v482_v2 = vadd.f32 %v480_v61, %v466_v63  ;;  %v744_v3 = vsel %vm483_vm1, 1.0, %v1012_v55  ;;  %v745_v4 = vsel %vm484_vm2, 1.0, %v1012_v55 }
  0xd6   : > { %v493_v6 = vmul.f32 %v744_v3, %v491_v49  ;;  %v494_v7 = vmul.f32 %v745_v4, %v491_v49  ;;  %v748_v8 = vsel %vm511_vm3, 1.0, %v1012_v55  ;;  %v749_v9 = vsel %vm512_vm4, 1.0, %v1012_v55 }
  0xd7   : > { %vm525_vm5 = vcmp.eq.s32.totalorder %v1158_v50, 5  ;;  %vm526_vm6 = vcmp.eq.s32.totalorder %v1160_v51, 5  ;;  %vm497_vm7 = vcmp.eq.s32.totalorder %v1158_v50, 3  ;;  %vm498_vm8 = vcmp.eq.s32.totalorder %v1160_v51, 3 }
  0xd8   : > { %v495_v11 = vadd.f32 %v493_v6, %v481_v1  ;;  %v496_v12 = vadd.f32 %v494_v7, %v482_v2  ;;  %v746_v14 = vsel %vm497_vm7, 1.0, %v1012_v55  ;;  %v747_v15 = vsel %vm498_vm8, 1.0, %v1012_v55 }
  0xd9   : > { %v521_v17 = vmul.f32 %v748_v8, %v519_v0  ;;  %v522_v18 = vmul.f32 %v749_v9, %v519_v0  ;;  %v507_v19 = vmul.f32 %v746_v14, %v505_v10  ;;  %v508_v20 = vmul.f32 %v747_v15, %v505_v10 }
  0xda   : > { %v750_v21 = vsel %vm525_vm5, 1.0, %v1012_v55  ;;  %v751_v22 = vsel %vm526_vm6, 1.0, %v1012_v55  ;;  %vm539_vm9 = vcmp.eq.s32.totalorder %v1158_v50, 6  ;;  %vm540_vm10 = vcmp.eq.s32.totalorder %v1160_v51, 6 }
  0xdb   : > { %v509_v23 = vadd.f32 %v507_v19, %v495_v11  ;;  %v510_v24 = vadd.f32 %v508_v20, %v496_v12  ;;  %vm553_vm11 = vcmp.eq.s32.totalorder %v1158_v50, 7  ;;  %vm554_vm12 = vcmp.eq.s32.totalorder %v1160_v51, 7 }
  0xdc   : > { %v752_v25 = vsel %vm539_vm9, 1.0, %v1012_v55  ;;  %v753_v26 = vsel %vm540_vm10, 1.0, %v1012_v55  ;;  %v434_v27 = vcombine.low %v1158_v50, %v1160_v51  ;;  %v535_v28 = vmul.f32 %v750_v21, %v533_v13 }
  0xdd   : > { %v536_v29 = vmul.f32 %v751_v22, %v533_v13  ;;  %v523_v30 = vadd.f32 %v521_v17, %v509_v23  ;;  %v524_v31 = vadd.f32 %v522_v18, %v510_v24  ;;  %v754_v33 = vsel %vm553_vm11, 1.0, %v1012_v55 }
  0xde   : > { %v755_v34 = vsel %vm554_vm12, 1.0, %v1012_v55  ;;  %v441_v35 = vrot.slane %v434_v27, %v440_v16  ;;  %vm451_vm13 = vcmp.lt.s32.totalorder %v298_v40, 256  ;;  %v549_v38 = vmul.f32 %v752_v25, %v547_v41 }
  0xdf   : > { %v537_v36 = vadd.f32 %v535_v28, %v523_v30  ;;  %v538_v37 = vadd.f32 %v536_v29, %v524_v31  ;;  %v550_v39 = vmul.f32 %v753_v26, %v547_v41  ;;  %v563_v43 = vmul.f32 %v754_v33, %v561_v32 }
  0xe0   : > { %v448_v42 = vrot.slane %v441_v35, %v440_v16  ;;  %v564_v44 = vmul.f32 %v755_v34, %v561_v32 }
  0xe1   : > { %v551_v45 = vadd.f32 %v549_v38, %v537_v36  ;;  %v552_v40 = vadd.f32 %v550_v39, %v538_v37 }
  0xe2   : > { %453 = vst.msk [vmem:[%s244_s13] sm:$0x3] %vm451_vm13, %v448_v42 }
  0xe3   : > { %v565_v46 = vadd.f32 %v563_v43, %v551_v45  ;;  %v566_v47 = vadd.f32 %v564_v44, %v552_v40 }
  0xe4   : > { %903 = shalt.err (!%p900_p3)
}
  0xe5   : > { %s904_s5 = scalar_lea.hbm %s1191_s24, 32  ;;  %s908_s21 = scalar_lea.hbm %s1270_s4, 64 }
  0xe6   : > { %p905_p5 = scmp.ne.s32.totalorder %s1191_s24, %s904_s5  ;;  %p909_p10 = scmp.lt.s32.totalorder %s1191_s24, %s1270_s4 }
  0xe7   : > { %p910_p4 = scmp.lt.s32.totalorder %s908_s21, %s904_s5 }
  0xe8   : > { %p906_p6 = pnand %p905_p5, %p1091_p9 }
  0xe9   : > { %p911_p13 = por %p910_p4, %p909_p10 }
  0xea   : > { %p907_p7 = pneg %p906_p6 }
  0xec   : > { %p912_p8 = pnand %p911_p13, %p907_p7 }
  0xee   : > { %915 = shalt.err (!%p912_p8)
}
  0xef   : > { %770 = dma.vmem_to_hbm [thread:$0]  (%p1091_p9), %s1193_s14, 32, %s1191_s24, %s578_s8   ;;  %v569_v48 = vcombine.low %v565_v46, %v566_v47 }
  0xf0   : > { %s592_s27 = scalar_lea.hbm %s1269_s3, %s765_s26  ;;  %s573_s5 = scalar_lea.sflag [#allocation4], %s1126_s25 }
  0xf1   : > { %571 = vst [vmem:[%s1198_s6] sm:$0xff] %v569_v48  ;;  %s916_s12 = scalar_lea.vmem %s595_s7, 128  ;;  %s1014_s13 = smov [#allocation5]  }
  0xf2   : > { %p917_p11 = scmp.ne.s32.totalorder %s595_s7, %s916_s12  ;;  %s920_s21 = sshll.u32 %s1014_s13, 4  ;;  %s921_s21 = int_to_ptr.vmem [resolvable:$false] %s920_s21 }
  0xf3   : > { %s922_s22 = scalar_lea.vmem %s921_s21, 256  ;;  %p923_p1 = scmp.lt.s32.totalorder %s595_s7, %s921_s21 }
  0xf4   : > { %p918_p12 = pnand %p917_p11, %p1091_p9  ;;  %p924_p2 = scmp.lt.s32.totalorder %s922_s22, %s916_s12 }
  0xf6   : > { %p919_p0 = pneg %p918_p12  ;;  %p925_p3 = por %p924_p2, %p923_p1 }
  0xf8   : > { %p926_p5 = pnand %p925_p3, %p919_p0 }
  0xfa   : > { %929 = shalt.err (!%p926_p5)
}
  0xfb   : > { %s930_s18 = scalar_lea.hbm %s592_s27, 128  ;;  %s934_s24 = scalar_lea.hbm %s1269_s3, 256 }
  0xfc   : > { %p931_p6 = scmp.ne.s32.totalorder %s592_s27, %s930_s18  ;;  %p935_p4 = scmp.lt.s32.totalorder %s592_s27, %s1269_s3 }
  0xfd   : > { %p936_p13 = scmp.lt.s32.totalorder %s934_s24, %s930_s18 }
  0xfe   : > { %p932_p7 = pnand %p931_p6, %p1091_p9 }
  0xff   : > { %p937_p8 = por %p936_p13, %p935_p4 }
 0x100   : > { %p933_p10 = pneg %p932_p7 }
 0x102   : > { %p938_p11 = pnand %p937_p8, %p933_p10 }
 0x104   : > { %941 = shalt.err (!%p938_p11)
}
 0x105   : > { %769 = dma.vmem_to_hbm [thread:$0]  (%p1091_p9), %s595_s7, 128, %s592_s27, %s573_s5  }
 0x106 PF: > { %s622_s8 = sand.u32 1, %s980_s15   ;;  %p1276_p12 = scmp.ne.s32.totalorder %s1274_s30, 0 }
 0x107   : > { %p1277_p0 = scmp.ge.s32.totalorder %s1000_s20, 2  ;;  %s623_s10 = scalar_lea.sflag [#allocation4], %s622_s8 }
 0x109   : > { %p778_p1 = pnand %p1277_p0, %p1276_p12 }
 0x10b   : > { %p779_p2 = pneg %p778_p1 }
 0x10d   : > { %971 = dma.done.wait (%p779_p2), %s623_s10, 128  }
 0x10e   : > { %973 = vsyncadd (%p779_p2), %s623_s10, 4294967168  ;;  %s632_s9 = scalar_lea.sflag [#allocation7], %s622_s8 }
 0x10f   : > { %975 = dma.done.wait (%p779_p2), %s632_s9, 32  }
 0x110   : > { %977 = vsyncadd (%p779_p2), %s632_s9, 4294967264  ;;  %s24_s20 = sadd.s32 1, %s1000_s20   ;;  %s1278_s15 = smov %s984_s16 }
 0x111   : > { %p21_p3 = scmp.ge.s32.totalorder %s24_s20, 4   ;;  %s1279_s16 = smov %s988_s17 }
 0x112   : > { %s1280_s17 = smov %s1096_s29  ;;  %s1281_s18 = smov %s996_s19 }
 0x113   : > { %s1282_s19 = smov %s1284_s23  ;;  %23 = sbr.rel (!%p21_p3) target bundleno = 8 (0x8), region = 94 }
 0x118   :  { %637 = vsyncpa [#allocation3], 1 }
 0x119   :  { %639 = vsyncpa [#allocation3 + $0x1], 1 }
 0x11a   :  { %640 = vsyncpa [#allocation4], 1 }
 0x11b   :  { %642 = vsyncpa [#allocation4 + $0x1], 1 }
 0x11c   :  { %643 = vsyncpa [#allocation7], 1 }
 0x11d   :  { %645 = vsyncpa [#allocation7 + $0x1], 1 }

</bundles_post_ra>
